<compile_context>
chip_gen: v7x
topology: tpu7x:2x2x1
jax: 0.10.0
libtpu: 0.0.40
codegen_flags: <defaults>
</compile_context>

<pallas_src>
import functools

import jax
import jax.numpy as jnp
from jax.experimental import pallas as pl
from jax.experimental.pallas import tpu as pltpu


def _conv_bn_act_kernel(p_ref, w_ref, shift_ref, o_ref):
    # im2col matmul on the MXU: bf16 operands, f32 accumulation.
    acc = jnp.dot(p_ref[...], w_ref[...], preferred_element_type=jnp.float32)
    # Folded (conv-bias + BatchNorm) shift, then ReLU — f32 epilogue on the
    # VPU; convert only at the store (bf16 output slab halves HBM writeback).
    y = jnp.maximum(acc + shift_ref[...], 0.0)
    o_ref[...] = y.astype(o_ref.dtype)


def _im2col(x_nhwc, kh, kw, stride, pad, dilation):
    """Builds [M = N*Ho*Wo, K = kh*kw*Cin] patches in the dtype of x_nhwc."""
    N, H, W, C = x_nhwc.shape
    xp = jnp.pad(x_nhwc, ((0, 0), (pad, pad), (pad, pad), (0, 0)))
    Ho = (H + 2 * pad - dilation * (kh - 1) - 1) // stride + 1
    Wo = (W + 2 * pad - dilation * (kw - 1) - 1) // stride + 1
    cols = []
    for i in range(kh):
        for j in range(kw):
            r0 = i * dilation
            c0 = j * dilation
            patch = xp[:, r0:r0 + (Ho - 1) * stride + 1:stride,
                          c0:c0 + (Wo - 1) * stride + 1:stride, :]
            cols.append(patch)                       # [N, Ho, Wo, C]
    patches = jnp.stack(cols, axis=3)                # [N, Ho, Wo, kh*kw, C]
    patches = patches.reshape(N * Ho * Wo, kh * kw * C)
    return patches, Ho, Wo


def _choose_tm(M, tm_max=1024):
    """Pick the row tile: big (mem-bound roofline), dividing M if possible,
    and leaving >= 2 grid steps so v7x's two TensorCores both get work."""
    if M <= 256:
        return M  # single full-extent tile (block == full dim is always legal)
    for tm in (1024, 896, 768, 640, 512, 448, 384, 320, 256, 192, 128, 64):
        if tm <= tm_max and M % tm == 0 and M // tm >= 2:
            return tm
    return min(tm_max, 512)  # fall back to padding M up to a multiple of tm


def _conv2d_bn_act_impl(x_nchw, weight, bias, gamma, beta, running_mean,
                        running_var, *, stride, padding, dilation, eps):
    """Fused Conv2d(groups=1, zeros pad) + BatchNorm2d(eval) + ReLU, NCHW."""
    N, Cin, H, W = x_nchw.shape
    Cout, _, kh, kw = weight.shape

    # bf16-first: cast BEFORE im2col so the 9x-inflated patch buffer is built
    # once, directly in bf16 (halves its HBM footprint; fused under jit).
    x_nhwc = jnp.transpose(x_nchw, (0, 2, 3, 1)).astype(jnp.bfloat16)
    patches, Ho, Wo = _im2col(x_nhwc, kh, kw, stride, padding, dilation)
    M, K = patches.shape

    # Weight matrix with the same (kh, kw, Cin) flattening order as patches.
    w_mat = jnp.transpose(weight, (2, 3, 1, 0)).reshape(K, Cout)

    # Fold conv bias + BatchNorm (inference) into weights and a single shift.
    scale = gamma / jnp.sqrt(running_var + eps)
    w_folded = w_mat * scale[None, :]
    shift_folded = (bias - running_mean) * scale + beta

    # Pad Cout to a lane-dense multiple of 128 (unmasked stores, full MXU
    # output columns).  K is left as-is: padding it would only inflate the
    # mem-bound patch reads for zero useful work.
    cout_pad = max(128, pl.cdiv(Cout, 128) * 128)
    w_bf16 = jnp.pad(w_folded, ((0, 0), (0, cout_pad - Cout))).astype(jnp.bfloat16)
    shift_f32 = jnp.pad(shift_folded, ((0, cout_pad - Cout),)
                        ).reshape(1, cout_pad).astype(jnp.float32)

    # Row tile: divides M when possible (no extra pad pass), >= 2 grid steps.
    tm = _choose_tm(M)
    m_pad = pl.cdiv(M, tm) * tm
    if m_pad != M:
        patches = jnp.pad(patches, ((0, m_pad - M), (0, 0)))

    grid = (m_pad // tm,)

    # Realistic scoped-VMEM budget: double-buffered tiles + resident operands,
    # with ~2x headroom — never the whole 64 MiB of a v7x core.
    vmem_need = (2 * tm * K * 2            # patch tiles (bf16, double-buffered)
                 + 2 * tm * cout_pad * 2   # output tiles (bf16, double-buffered)
                 + 2 * K * cout_pad * 2    # weights
                 + 2 * cout_pad * 4)       # shift
    vmem_limit = int(min(32 * 1024 * 1024, max(4 * 1024 * 1024, 2 * vmem_need)))

    cost = pl.CostEstimate(
        flops=2 * m_pad * K * cout_pad,
        transcendentals=0,
        bytes_accessed=(m_pad * K * 2 + K * cout_pad * 2
                        + cout_pad * 4 + m_pad * cout_pad * 2))

    out_flat = pl.pallas_call(
        _conv_bn_act_kernel,
        out_shape=jax.ShapeDtypeStruct((m_pad, cout_pad), jnp.bfloat16),
        grid=grid,
        in_specs=[
            # Row tile of the im2col matrix — pipelined (double-buffered DMA).
            pl.BlockSpec((tm, K), lambda i: (i, 0)),
            # Folded weights and shift — small, VMEM-resident across the grid.
            # (pipeline_mode tuning for resident operands is negligible at
            #  K = kh*kw*Cin this small; revisit for real layer sizes.)
            pl.BlockSpec((K, cout_pad), lambda i: (0, 0)),
            pl.BlockSpec((1, cout_pad), lambda i: (0, 0)),
        ],
        out_specs=pl.BlockSpec((tm, cout_pad), lambda i: (i, 0)),
        compiler_params=pltpu.CompilerParams(
            # Independent row tiles -> shard across the 2 TensorCores on v7x.
            dimension_semantics=("parallel",),
            vmem_limit_bytes=vmem_limit),
        cost_estimate=cost,
    )(patches, w_bf16, shift_f32)

    # Slice off padding, restore NCHW f32 (module semantics); fused under the
    # same jit, and it only touches the real M x Cout elements.
    out = out_flat[:M, :Cout].astype(jnp.float32).reshape(N, Ho, Wo, Cout)
    return jnp.transpose(out, (0, 3, 1, 2))


conv2d_bn_act = jax.jit(
    _conv2d_bn_act_impl,
    static_argnames=("stride", "padding", "dilation", "eps"))


def _reference(x, weight, bias, gamma, beta, mean, var,
               *, stride, padding, dilation, eps):
    y = jax.lax.conv_general_dilated(
        x, weight, window_strides=(stride, stride),
        padding=[(padding, padding), (padding, padding)],
        rhs_dilation=(dilation, dilation),
        dimension_numbers=('NCHW', 'OIHW', 'NCHW'))
    y = y + bias.reshape(1, -1, 1, 1)
    y = (y - mean.reshape(1, -1, 1, 1)) * (
        gamma.reshape(1, -1, 1, 1) / jnp.sqrt(var.reshape(1, -1, 1, 1) + eps)
    ) + beta.reshape(1, -1, 1, 1)
    return jnp.maximum(y, 0.0)


if __name__ == "__main__":
    # Module hyperparameters for this synthetic instance:
    # in_channels=4, out_channels=8, kernel_size=3, stride=1, padding=1,
    # dilation=1, groups=1, bias=True, padding_mode='zeros',
    # norm=BatchNorm2d(8) in eval mode, activation=ReLU.
    N, Cin, H, W = 2, 4, 16, 16
    Cout, kh, kw = 8, 3, 3
    stride, padding, dilation, eps = 1, 1, 1, 1e-5

    key = jax.random.PRNGKey(0)
    kx, kw_, kb, kg, kbe, km, kv = jax.random.split(key, 7)
    x = jax.random.normal(kx, (N, Cin, H, W), dtype=jnp.float32)
    weight = jax.random.normal(kw_, (Cout, Cin, kh, kw), dtype=jnp.float32) * 0.1
    bias = jax.random.normal(kb, (Cout,), dtype=jnp.float32) * 0.1
    gamma = 1.0 + 0.1 * jax.random.normal(kg, (Cout,), dtype=jnp.float32)
    beta = 0.1 * jax.random.normal(kbe, (Cout,), dtype=jnp.float32)
    running_mean = 0.1 * jax.random.normal(km, (Cout,), dtype=jnp.float32)
    running_var = jnp.abs(jax.random.normal(kv, (Cout,), dtype=jnp.float32)) + 0.5

    out = conv2d_bn_act(x, weight, bias, gamma, beta, running_mean, running_var,
                        stride=stride, padding=padding, dilation=dilation, eps=eps)
    out = jax.block_until_ready(out)

    ref = _reference(x, weight, bias, gamma, beta, running_mean, running_var,
                     stride=stride, padding=padding, dilation=dilation, eps=eps)
    assert out.shape == (N, Cout, H, W)
    # bf16 matmul operands + bf16 output slab (f32 accumulation / epilogue) ->
    # compare against the f32 reference with a bf16-appropriate tolerance.
    assert jnp.allclose(out, ref, atol=2e-2, rtol=2e-2)

    print("KERNEL_OK")
</pallas_src>

<mosaic_0001>
module attributes {stable_mosaic.version = 11 : i64} {
  func.func @_conv_bn_act_kernel(%arg0: i32, %arg1: memref<256x36xbf16, #tpu.memory_space<vmem>>, %arg2: memref<36x128xbf16, #tpu.memory_space<vmem>>, %arg3: memref<1x128xf32, #tpu.memory_space<vmem>>, %arg4: memref<256x128xbf16, #tpu.memory_space<vmem>>) attributes {dimension_semantics = [#tpu.dimension_semantics<parallel>], iteration_bounds = array<i64: 2>, scalar_prefetch = 0 : i64, scratch_operands = 0 : i64, tpu.core_type = #tpu.core_type<tc>, window_params = [{transform_indices = @transform_0, window_bounds = array<i64: 256, 36>}, {pipeline_mode = #tpu.pipeline_mode<synchronous>, transform_indices = @transform_1, window_bounds = array<i64: 36, 128>}, {pipeline_mode = #tpu.pipeline_mode<synchronous>, transform_indices = @transform_2, window_bounds = array<i64: 1, 128>}, {transform_indices = @transform_3, window_bounds = array<i64: 256, 128>}]} {
    %c0 = arith.constant 0 : index
    %c0_0 = arith.constant 0 : index
    %0 = vector.load %arg1[%c0, %c0_0] : memref<256x36xbf16, #tpu.memory_space<vmem>>, vector<256x36xbf16>
    %c0_1 = arith.constant 0 : index
    %c0_2 = arith.constant 0 : index
    %1 = vector.load %arg2[%c0_1, %c0_2] : memref<36x128xbf16, #tpu.memory_space<vmem>>, vector<36x128xbf16>
    %cst = arith.constant dense<0.000000e+00> : vector<256x128xf32>
    %2 = tpu.matmul %0, %1, %cst {dimension_numbers = #tpu.dot_dimension_numbers<[1], [0], [0], [1], [0, 0, 1, 1], [], []>} : vector<256x36xbf16>, vector<36x128xbf16>, vector<256x128xf32> -> vector<256x128xf32>
    %c0_3 = arith.constant 0 : index
    %c0_4 = arith.constant 0 : index
    %3 = vector.load %arg3[%c0_3, %c0_4] : memref<1x128xf32, #tpu.memory_space<vmem>>, vector<1x128xf32>
    %4 = vector.broadcast %3 : vector<1x128xf32> to vector<256x128xf32>
    %5 = arith.addf %2, %4 : vector<256x128xf32>
    %cst_5 = arith.constant 0.000000e+00 : f32
    %6 = vector.broadcast %cst_5 : f32 to vector<256x128xf32>
    %7 = arith.maximumf %5, %6 : vector<256x128xf32>
    %8 = arith.truncf %7 : vector<256x128xf32> to vector<256x128xbf16>
    %c0_6 = arith.constant 0 : index
    %c0_7 = arith.constant 0 : index
    %9 = vector.load %arg4[%c0_6, %c0_7] : memref<256x128xbf16, #tpu.memory_space<vmem>>, vector<256x128xbf16>
    tpu.vector_store %arg4[%c0_6, %c0_7], %8 {strides = array<i32>} : memref<256x128xbf16, #tpu.memory_space<vmem>>, vector<256x128xbf16>,
    return
  }
  func.func @transform_0(%arg0: i32) -> (i32, i32) {
    %c0_i32 = arith.constant 0 : i32
    %c0_i32_0 = arith.constant 0 : i32
    return %arg0, %c0_i32 : i32, i32
  }
  func.func @transform_1(%arg0: i32) -> (i32, i32) {
    %c0_i32 = arith.constant 0 : i32
    %c0_i32_0 = arith.constant 0 : i32
    %c0_i32_1 = arith.constant 0 : i32
    return %c0_i32, %c0_i32_0 : i32, i32
  }
  func.func @transform_2(%arg0: i32) -> (i32, i32) {
    %c0_i32 = arith.constant 0 : i32
    %c0_i32_0 = arith.constant 0 : i32
    %c0_i32_1 = arith.constant 0 : i32
    return %c0_i32, %c0_i32_0 : i32, i32
  }
  func.func @transform_3(%arg0: i32) -> (i32, i32) {
    %c0_i32 = arith.constant 0 : i32
    %c0_i32_0 = arith.constant 0 : i32
    return %arg0, %c0_i32 : i32, i32
  }
}

</mosaic_0001>

<bundles_post_ra>
// kernel: _conv2d_bn_act_impl.1
= control target key start
LH: loop header
LB: loop body
LE: loop exit
PB: predicated region body
PF: predicated region fallthrough
CT: control target
= control target key end

     0   :  { %s1102_s12 = smov 0   ;;  %s1224_s0 = inlined_call_operand.vmem [shape: bf16[512,36], index: 0, kind: input, shape index: {}]   ;;  %s1225_s1 = inlined_call_operand.vmem [shape: bf16[36,128], index: 1, kind: input, shape index: {}]   ;;  %s1226_s2 = inlined_call_operand.vmem [shape: f32[1,128], index: 2, kind: input, shape index: {}]   ;;  %s1227_s3 = inlined_call_operand.vmem [shape: bf16[512,128], index: 3, kind: output, shape index: {}]  }
   0x1 LB: > { %s776_s13 = sadd.s32 4294967295, %s1080_s12   ;;  %p780_p0 = scmp.ge.s32.totalorder %s1080_s12, 1  ;;  %s1080_s12 = sphi %s1102_s12, %s13_s12  }
   0x2   : > { %p138_p1 = scmp.lt.s32.totalorder %s1080_s12, 3 }
   0x4   : > { %p139_p2 = pnand %p780_p0, %p138_p1 }
   0x5   : > { %v1055_v0 = vld [vmem:[%s1225_s1] sm:$0xff] (!%p139_p2)   ;;  %v1056_v1 = vld [vmem:[%s1225_s1 + $0x8] sm:$0xff] (!%p139_p2)   ;;  %s781_s18 = sshll.u32 (!%p139_p2), %s776_s13, 5  ;;  %v1057_v2 = vld [vmem:[%s1225_s1 + $0x10] ss:$0 sps:$4 sm:$0x33] (!%p139_p2)  }
   0x6   : > { %142 = sbr.rel (%p139_p2) target bundleno = 265 (0x109), region = 32  ;;  %1001 = vmatprep.subr.bf16.mxu0 (!%p139_p2), %v1055_v0  ;;  %1039 = vmatprep.subr.bf16.mxu1 (!%p139_p2), %v1055_v0  ;;  %p163_p3 = scmp.lt.s32.totalorder (!%p139_p2), %s781_s18, 63  ;;  %vm363_vm0 = vcmask (!%p139_p2), 1041408   ;;  %vm314_vm1 = vcmask (!%p139_p2), 293888   ;;  %v1164_v20 = vld [vmem:[%s1226_s2] ss:$0 sm:$0xff] (!%p139_p2) }
   0x7   : > { %1002 = vmatpush3.bf16.msra.mxu0 (!%p139_p2), %v1055_v0  ;;  %1042 = vmatpush3.bf16.msra.mxu1 (!%p139_p2), %v1055_v0  ;;  %v365_v3 = vsel (!%p139_p2), %vm363_vm0, %v1057_v2, 0 }
   0x8   : > { %1003 = vmatprep.subr.bf16.mxu0 (!%p139_p2), %v1056_v1  ;;  %1040 = vmatprep.subr.bf16.mxu1 (!%p139_p2), %v1056_v1 }
   0xb   : > { %1004 = vmatpush3.bf16.msra.mxu0 (!%p139_p2), %v1056_v1  ;;  %1043 = vmatpush3.bf16.msra.mxu1 (!%p139_p2), %v1056_v1 }
   0xc   : > { %1045 = vmatprep.subr.msk.bf16.mxu0 (!%p139_p2), %vm363_vm0, %v1057_v2  ;;  %1046 = vmatprep.subr.msk.bf16.mxu1 (!%p139_p2), %vm363_vm0, %v1057_v2 }
   0xd   : > { %s1229_s18 = smov (!%p163_p3, %s781_s18), 63 }
   0xe   : > { %s782_s21 = sshll.u32 %s1229_s18, 2 }
   0xf   : > { %s1127_s24 = scalar_lea.vmem %s1224_s0, %s782_s21  ;;  %1006 = vmatpush3.bf16.msra.mxu0 %v365_v3  ;;  %1044 = vmatpush3.bf16.msra.mxu1 %v365_v3  ;;  %s1179_s29 = scalar_lea.vmem %s1227_s3, %s782_s21 }
  0x10   : > { %v1058_v4 = vld [vmem:[%s1127_s24] sm:$0xff]   ;;  %v1060_v6 = vld [vmem:[%s1127_s24 + $0x8] sm:$0xff]   ;;  %v1062_v8 = vld [vmem:[%s1127_s24 + $0x10] sm:$0xff]  }
  0x11   : > { %v1059_v5 = vld [vmem:[%s1127_s24 + $0x40] sm:$0xff]   ;;  %1007 = vmatprep.mubr.msk.bf16.mxu0 %vm314_vm1, %v1058_v4  ;;  %v1061_v7 = vld [vmem:[%s1127_s24 + $0x48] sm:$0xff]   ;;  %v1063_v9 = vld [vmem:[%s1127_s24 + $0x50] sm:$0xff]  }
  0x12   : > { %1023 = vmatprep.mubr.msk.bf16.mxu1 %vm314_vm1, %v1059_v5  ;;  %1008 = vmatmul.mubr.msk.bf16.vlgmr.msra.gmra.mrb[0].mxu0 %vm314_vm1, %v1060_v6  ;;  %v1064_v10 = vld [vmem:[%s1127_s24 + $0x18] sm:$0xff]   ;;  %v1066_v12 = vld [vmem:[%s1127_s24 + $0x20] sm:$0xff]   ;;  %v1068_v14 = vld [vmem:[%s1127_s24 + $0x28] sm:$0xff]  }
  0x13   : > { %1024 = vmatmul.mubr.msk.bf16.vlgmr.msra.gmra.mrb[0].mxu1 %vm314_vm1, %v1061_v7  ;;  %1011 = vmatprep.mubr.msk.bf16.mxu0 %vm314_vm1, %v1062_v8  ;;  %v1065_v11 = vld [vmem:[%s1127_s24 + $0x58] sm:$0xff]   ;;  %v1067_v13 = vld [vmem:[%s1127_s24 + $0x60] sm:$0xff]   ;;  %v1069_v15 = vld [vmem:[%s1127_s24 + $0x68] sm:$0xff]  }
  0x14   : > { %1027 = vmatprep.mubr.msk.bf16.mxu1 %vm314_vm1, %v1063_v9  ;;  %v1070_v16 = vld [vmem:[%s1127_s24 + $0x30] sm:$0xff]   ;;  %v1072_v18 = vld [vmem:[%s1127_s24 + $0x38] sm:$0xff]  }
  0x15   : > { %v1071_v17 = vld [vmem:[%s1127_s24 + $0x70] sm:$0xff]   ;;  %v1073_v19 = vld [vmem:[%s1127_s24 + $0x78] sm:$0xff]  }
  0x1a   : > { %1012 = vmatmul.mubr.msk.bf16.gmra.mrb[4].mxu0 %vm314_vm1, %v1064_v10 }
  0x1b   : > { %1028 = vmatmul.mubr.msk.bf16.gmra.mrb[4].mxu1 %vm314_vm1, %v1065_v11  ;;  %1015 = vmatprep.mubr.msk.bf16.mxu0 %vm314_vm1, %v1066_v12 }
  0x1c   : > { %1031 = vmatprep.mubr.msk.bf16.mxu1 %vm314_vm1, %v1067_v13 }
  0x22   : > { %1016 = vmatmul.mubr.msk.bf16.gmra.mrb[8].mxu0 %vm314_vm1, %v1068_v14 }
  0x23   : > { %1032 = vmatmul.mubr.msk.bf16.gmra.mrb[8].mxu1 %vm314_vm1, %v1069_v15  ;;  %1019 = vmatprep.mubr.msk.bf16.mxu0 %vm314_vm1, %v1070_v16 }
  0x24   : > { %1035 = vmatprep.mubr.msk.bf16.mxu1 %vm314_vm1, %v1071_v17 }
  0x2a   : > { %1020 = vmatmul.mubr.msk.bf16.gmra.mrb[12].mxu0 %vm314_vm1, %v1072_v18 }
  0x2b   : > { %1036 = vmatmul.mubr.msk.bf16.gmra.mrb[12].mxu1 %vm314_vm1, %v1073_v19 }
  0xe5   : > { %v1009_v21 = vpop.f32.mrb[0].mxu0 }
  0xe6   : > { %v1025_v22 = vpop.f32.mrb[0].mxu1  ;;  %v410_v23 = vadd.f32 %v1009_v21, %v1164_v20  ;;  %v401_v25 = vpop.f32.mrb[1].mxu0 }
  0xe7   : > { %v474_v24 = vadd.f32 %v1025_v22, %v1164_v20  ;;  %v465_v26 = vpop.f32.mrb[1].mxu1  ;;  %v402_v27 = vadd.f32 %v1164_v20, %v401_v25  ;;  %v1010_v29 = vpop.f32.mrb[2].mxu0 }
  0xe8   : > { %v466_v28 = vadd.f32 %v1164_v20, %v465_v26  ;;  %v1026_v30 = vpop.f32.mrb[2].mxu1  ;;  %v413_v31 = vadd.f32 %v1010_v29, %v1164_v20  ;;  %v404_v33 = vpop.f32.mrb[3].mxu0  ;;  %v530_v37 = vmax.f32 %v410_v23, 0.0 }
  0xe9   : > { %v477_v32 = vadd.f32 %v1026_v30, %v1164_v20  ;;  %v468_v34 = vpop.f32.mrb[3].mxu1  ;;  %v405_v35 = vadd.f32 %v1164_v20, %v404_v33  ;;  %v546_v38 = vmax.f32 %v474_v24, 0.0  ;;  %v528_v41 = vmax.f32 %v402_v27, 0.0 }
  0xea   : > { %v469_v36 = vadd.f32 %v1164_v20, %v468_v34  ;;  %v531_v39 = vmax.f32 %v413_v31, 0.0  ;;  %v544_v42 = vmax.f32 %v466_v28, 0.0 }
  0xeb   : > { %v547_v40 = vmax.f32 %v477_v32, 0.0  ;;  %v529_v43 = vmax.f32 %v405_v35, 0.0 }
  0xec   : > { %v545_v44 = vmax.f32 %v469_v36, 0.0  ;;  %v895_v45 = vpack.c.bf16 %v531_v39, %v530_v37 }
  0xed   : > { %v935_v46 = vpack.c.bf16 %v547_v40, %v546_v38  ;;  %v890_v47 = vpack.c.bf16 %v529_v43, %v528_v41  ;;  %v1013_v49 = vpop.f32.mrb[4].mxu0 }
  0xee   : > { %v930_v48 = vpack.c.bf16 %v545_v44, %v544_v42  ;;  %v1029_v50 = vpop.f32.mrb[4].mxu1  ;;  %967 = vst [vmem:[%s1179_s29 + $0x8] sm:$0xff] %v895_v45   ;;  %v426_v51 = vadd.f32 %v1013_v49, %v1164_v20  ;;  %v417_v53 = vpop.f32.mrb[5].mxu0 }
  0xef   : > { %975 = vst [vmem:[%s1179_s29 + $0x48] sm:$0xff] %v935_v46   ;;  %v490_v52 = vadd.f32 %v1029_v50, %v1164_v20  ;;  %v481_v54 = vpop.f32.mrb[5].mxu1  ;;  %891 = vst [vmem:[%s1179_s29] sm:$0xff] %v890_v47   ;;  %v418_v55 = vadd.f32 %v1164_v20, %v417_v53  ;;  %v1014_v57 = vpop.f32.mrb[6].mxu0 }
  0xf0   : > { %974 = vst [vmem:[%s1179_s29 + $0x40] sm:$0xff] %v930_v48   ;;  %v482_v56 = vadd.f32 %v1164_v20, %v481_v54  ;;  %v1030_v58 = vpop.f32.mrb[6].mxu1  ;;  %v429_v59 = vadd.f32 %v1014_v57, %v1164_v20  ;;  %v420_v61 = vpop.f32.mrb[7].mxu0  ;;  %v534_v1 = vmax.f32 %v426_v51, 0.0 }
  0xf1   : > { %v493_v60 = vadd.f32 %v1030_v58, %v1164_v20  ;;  %v484_v62 = vpop.f32.mrb[7].mxu1  ;;  %v421_v63 = vadd.f32 %v1164_v20, %v420_v61  ;;  %v550_v2 = vmax.f32 %v490_v52, 0.0  ;;  %v532_v5 = vmax.f32 %v418_v55, 0.0 }
  0xf2   : > { %v485_v0 = vadd.f32 %v1164_v20, %v484_v62  ;;  %v535_v3 = vmax.f32 %v429_v59, 0.0  ;;  %v548_v6 = vmax.f32 %v482_v56, 0.0 }
  0xf3   : > { %v551_v4 = vmax.f32 %v493_v60, 0.0  ;;  %v533_v7 = vmax.f32 %v421_v63, 0.0 }
  0xf4   : > { %v549_v8 = vmax.f32 %v485_v0, 0.0  ;;  %v905_v9 = vpack.c.bf16 %v535_v3, %v534_v1 }
  0xf5   : > { %v945_v10 = vpack.c.bf16 %v551_v4, %v550_v2  ;;  %v900_v11 = vpack.c.bf16 %v533_v7, %v532_v5  ;;  %v1017_v13 = vpop.f32.mrb[8].mxu0 }
  0xf6   : > { %v940_v12 = vpack.c.bf16 %v549_v8, %v548_v6  ;;  %v1033_v14 = vpop.f32.mrb[8].mxu1  ;;  %969 = vst [vmem:[%s1179_s29 + $0x18] sm:$0xff] %v905_v9   ;;  %v442_v15 = vadd.f32 %v1017_v13, %v1164_v20  ;;  %v433_v17 = vpop.f32.mrb[9].mxu0 }
  0xf7   : > { %977 = vst [vmem:[%s1179_s29 + $0x58] sm:$0xff] %v945_v10   ;;  %v506_v16 = vadd.f32 %v1033_v14, %v1164_v20  ;;  %v497_v18 = vpop.f32.mrb[9].mxu1  ;;  %968 = vst [vmem:[%s1179_s29 + $0x10] sm:$0xff] %v900_v11   ;;  %v434_v19 = vadd.f32 %v1164_v20, %v433_v17  ;;  %v1018_v22 = vpop.f32.mrb[10].mxu0 }
  0xf8   : > { %976 = vst [vmem:[%s1179_s29 + $0x50] sm:$0xff] %v940_v12   ;;  %v498_v21 = vadd.f32 %v1164_v20, %v497_v18  ;;  %v1034_v23 = vpop.f32.mrb[10].mxu1  ;;  %v445_v24 = vadd.f32 %v1018_v22, %v1164_v20  ;;  %v436_v26 = vpop.f32.mrb[11].mxu0  ;;  %v538_v30 = vmax.f32 %v442_v15, 0.0 }
  0xf9   : > { %v509_v25 = vadd.f32 %v1034_v23, %v1164_v20  ;;  %v500_v27 = vpop.f32.mrb[11].mxu1  ;;  %v437_v28 = vadd.f32 %v1164_v20, %v436_v26  ;;  %v554_v31 = vmax.f32 %v506_v16, 0.0  ;;  %v536_v34 = vmax.f32 %v434_v19, 0.0 }
  0xfa   : > { %v501_v29 = vadd.f32 %v1164_v20, %v500_v27  ;;  %v539_v32 = vmax.f32 %v445_v24, 0.0  ;;  %v552_v35 = vmax.f32 %v498_v21, 0.0 }
  0xfb   : > { %v555_v33 = vmax.f32 %v509_v25, 0.0  ;;  %v537_v36 = vmax.f32 %v437_v28, 0.0 }
  0xfc   : > { %v553_v37 = vmax.f32 %v501_v29, 0.0  ;;  %v915_v38 = vpack.c.bf16 %v539_v32, %v538_v30 }
  0xfd   : > { %v955_v39 = vpack.c.bf16 %v555_v33, %v554_v31  ;;  %v910_v40 = vpack.c.bf16 %v537_v36, %v536_v34  ;;  %v1021_v42 = vpop.f32.mrb[12].mxu0 }
  0xfe   : > { %v950_v41 = vpack.c.bf16 %v553_v37, %v552_v35  ;;  %v1037_v43 = vpop.f32.mrb[12].mxu1  ;;  %971 = vst [vmem:[%s1179_s29 + $0x28] sm:$0xff] %v915_v38   ;;  %v458_v44 = vadd.f32 %v1021_v42, %v1164_v20  ;;  %v449_v46 = vpop.f32.mrb[13].mxu0 }
  0xff   : > { %979 = vst [vmem:[%s1179_s29 + $0x68] sm:$0xff] %v955_v39   ;;  %v522_v45 = vadd.f32 %v1037_v43, %v1164_v20  ;;  %v513_v47 = vpop.f32.mrb[13].mxu1  ;;  %970 = vst [vmem:[%s1179_s29 + $0x20] sm:$0xff] %v910_v40   ;;  %v450_v48 = vadd.f32 %v1164_v20, %v449_v46  ;;  %v1022_v50 = vpop.f32.mrb[14].mxu0 }
 0x100   : > { %978 = vst [vmem:[%s1179_s29 + $0x60] sm:$0xff] %v950_v41   ;;  %v514_v49 = vadd.f32 %v1164_v20, %v513_v47  ;;  %v1038_v51 = vpop.f32.mrb[14].mxu1  ;;  %v461_v52 = vadd.f32 %v1022_v50, %v1164_v20  ;;  %v452_v54 = vpop.f32.mrb[15].mxu0  ;;  %v542_v58 = vmax.f32 %v458_v44, 0.0 }
 0x101   : > { %v525_v53 = vadd.f32 %v1038_v51, %v1164_v20  ;;  %v516_v55 = vpop.f32.mrb[15].mxu1  ;;  %v453_v56 = vadd.f32 %v1164_v20, %v452_v54  ;;  %v558_v59 = vmax.f32 %v522_v45, 0.0  ;;  %v540_v62 = vmax.f32 %v450_v48, 0.0 }
 0x102   : > { %v517_v57 = vadd.f32 %v1164_v20, %v516_v55  ;;  %v543_v60 = vmax.f32 %v461_v52, 0.0  ;;  %v556_v63 = vmax.f32 %v514_v49, 0.0 }
 0x103   : > { %v559_v61 = vmax.f32 %v525_v53, 0.0  ;;  %v541_v0 = vmax.f32 %v453_v56, 0.0 }
 0x104   : > { %v557_v1 = vmax.f32 %v517_v57, 0.0  ;;  %v925_v2 = vpack.c.bf16 %v543_v60, %v542_v58 }
 0x105   : > { %v965_v3 = vpack.c.bf16 %v559_v61, %v558_v59  ;;  %v920_v4 = vpack.c.bf16 %v541_v0, %v540_v62 }
 0x106   : > { %v960_v5 = vpack.c.bf16 %v557_v1, %v556_v63  ;;  %973 = vst [vmem:[%s1179_s29 + $0x38] sm:$0xff] %v925_v2  }
 0x107   : > { %981 = vst [vmem:[%s1179_s29 + $0x78] sm:$0xff] %v965_v3   ;;  %972 = vst [vmem:[%s1179_s29 + $0x30] sm:$0xff] %v920_v4  }
 0x108   : > { %980 = vst [vmem:[%s1179_s29 + $0x70] sm:$0xff] %v960_v5  }
 0x109 PF: > { %s13_s12 = sadd.s32 1, %s1080_s12  }
 0x10a   : > { %p10_p4 = scmp.ge.s32.totalorder %s13_s12, 4  }
 0x10c   :  { %12 = sbr.rel (!%p10_p4) target bundleno = 1 (0x1), region = 62 }

</bundles_post_ra>
